<compile_context>
chip_gen: v7x
topology: tpu7x:2x2x1
jax: 0.10.0
libtpu: 0.0.40
codegen_flags: <defaults>
</compile_context>

<pallas_src>
import jax
import jax.numpy as jnp
from jax.experimental import pallas as pl
from jax.experimental.pallas import tpu as pltpu


# --- counter-based Bernoulli(0.5) mask (int32-only, portable) ---------------
_PHI = -1640531527   # 0x9E3779B9 as int32
_C1 = -2048144789    # 0x85EBCA6B as int32
_C2 = -1028477387    # 0xC2B2AE35 as int32


def _keep_mask(idx, seed):
    """Deterministic hash of (seed, element index) -> bool keep mask, p=0.5."""
    h = idx ^ (seed * jnp.int32(_PHI))
    h = h * jnp.int32(_C1)
    h = h ^ ((h >> 16) & jnp.int32(0xFFFF))   # logical-shift equivalent
    h = h * jnp.int32(_C2)
    h = h ^ ((h >> 16) & jnp.int32(0xFFFF))
    return h >= 0                             # top bit clear -> keep


# --- kernel ------------------------------------------------------------------
def multilayer_kernel(seed_ref, x_ref, w_ref, b_ref, o_ref):
    tm, f_in = x_ref.shape

    # Dropout(p=0.5), fused into one select. The mask is keyed on the GLOBAL
    # element index, so every row tile draws an independent pattern.
    row0 = pl.program_id(0) * tm
    rows = jax.lax.broadcasted_iota(jnp.int32, (tm, f_in), 0) + row0
    cols = jax.lax.broadcasted_iota(jnp.int32, (tm, f_in), 1)
    keep = _keep_mask(rows * jnp.int32(f_in) + cols, seed_ref[0])
    x = jnp.where(keep, x_ref[...] * 2.0, 0.0).astype(jnp.bfloat16)

    # Linear: bf16 MXU matmul, f32 accumulation, + bias.
    y = jnp.dot(x, w_ref[...], preferred_element_type=jnp.float32)
    y = y + b_ref[...]

    # Activation (ReLU).
    o_ref[...] = jnp.maximum(y, 0.0)


# --- wrapper -----------------------------------------------------------------
def multilayer_forward(feat, w_t, bias, seed, *, tm=128):
    """feat: [N, F_in] f32; w_t: [F_in, F_out] bf16 (pre-transposed at init);
    bias: [F_out] f32; seed: python int."""
    n, f_in = feat.shape
    f_in_w, f_out = w_t.shape
    assert f_in == f_in_w

    n_tiles = -(-n // tm)
    n_pad = n_tiles * tm
    if n_pad != n:
        feat = jnp.pad(feat, ((0, n_pad - n), (0, 0)))

    seed_arr = jnp.asarray([seed], dtype=jnp.int32)
    b2d = bias.reshape(1, f_out).astype(jnp.float32)

    out = pl.pallas_call(
        multilayer_kernel,
        out_shape=jax.ShapeDtypeStruct((n_pad, f_out), jnp.float32),
        grid_spec=pltpu.PrefetchScalarGridSpec(
            num_scalar_prefetch=1,              # seed -> SMEM
            grid=(n_tiles,),
            in_specs=[
                pl.BlockSpec((tm, f_in), lambda i, seed: (i, 0)),     # feat tile
                pl.BlockSpec((f_in, f_out), lambda i, seed: (0, 0)),  # W^T resident
                pl.BlockSpec((1, f_out), lambda i, seed: (0, 0)),     # bias
            ],
            out_specs=pl.BlockSpec((tm, f_out), lambda i, seed: (i, 0)),
        ),
        compiler_params=pltpu.CompilerParams(
            dimension_semantics=("parallel",),   # shard row tiles across TCs
        ),
    )(seed_arr, feat, w_t, b2d)
    return out[:n]


# --- pure-JAX reference (same hash mask) for correctness check ---------------
def reference_forward(feat, w_t, bias, seed):
    n, f_in = feat.shape
    rows = jnp.arange(n, dtype=jnp.int32)[:, None]
    cols = jnp.arange(f_in, dtype=jnp.int32)[None, :]
    keep = _keep_mask(rows * jnp.int32(f_in) + cols, jnp.int32(seed))
    x = jnp.where(keep, feat * 2.0, 0.0).astype(jnp.bfloat16)
    y = jnp.dot(x, w_t, preferred_element_type=jnp.float32) + bias[None, :]
    return jnp.maximum(y, 0.0)


def xavier_uniform(key, shape, gain):
    # nn.init.xavier_uniform_ on a (fan_out, fan_in) Linear weight.
    fan_out, fan_in = shape
    a = gain * jnp.sqrt(6.0 / (fan_in + fan_out))
    return jax.random.uniform(key, shape, jnp.float32, minval=-a, maxval=a)


if __name__ == "__main__":
    # Lane-dense, tiled demo: 256 nodes, 128 -> 128 features (2 row tiles).
    N, IN_FEATS, OUT_FEATS = 256, 128, 128

    key = jax.random.PRNGKey(0)
    k_feat, k_w, k_b = jax.random.split(key, 3)

    feat = jax.random.normal(k_feat, (N, IN_FEATS), dtype=jnp.float32)

    gain = float(jnp.sqrt(2.0))                 # nn.init.calculate_gain('relu')
    weight = xavier_uniform(k_w, (OUT_FEATS, IN_FEATS), gain)
    bound = 1.0 / float(jnp.sqrt(IN_FEATS))     # nn.Linear default bias init
    bias = jax.random.uniform(k_b, (OUT_FEATS,), jnp.float32,
                              minval=-bound, maxval=bound)

    # Init-time prep (NOT in the hot path): pre-transpose to [F_in, F_out] and
    # cast to bf16 for the MXU / halved weight-DMA bytes.
    w_t = jnp.asarray(weight.T, dtype=jnp.bfloat16)

    out = multilayer_forward(feat, w_t, bias, seed=0)
    jax.block_until_ready(out)

    ref = reference_forward(feat, w_t, bias, seed=0)

    assert out.shape == (N, OUT_FEATS)
    assert bool(jnp.all(out >= 0.0))            # ReLU output is non-negative
    assert bool(jnp.allclose(out, ref, rtol=1e-2, atol=1e-2))
    print("KERNEL_OK")
</pallas_src>

<mosaic_0001>
module attributes {stable_mosaic.version = 11 : i64} {
  func.func @multilayer_kernel(%arg0: i32, %arg1: memref<1xi32, #tpu.memory_space<smem>>, %arg2: memref<128x128xf32, #tpu.memory_space<vmem>>, %arg3: memref<128x128xbf16, #tpu.memory_space<vmem>>, %arg4: memref<1x128xf32, #tpu.memory_space<vmem>>, %arg5: memref<128x128xf32, #tpu.memory_space<vmem>>) attributes {dimension_semantics = [#tpu.dimension_semantics<parallel>], iteration_bounds = array<i64: 2>, scalar_prefetch = 1 : i64, scratch_operands = 0 : i64, tpu.core_type = #tpu.core_type<tc>, window_params = [{transform_indices = @transform_0, window_bounds = array<i64: 128, 128>}, {pipeline_mode = #tpu.pipeline_mode<synchronous>, transform_indices = @transform_1, window_bounds = array<i64: 128, 128>}, {pipeline_mode = #tpu.pipeline_mode<synchronous>, transform_indices = @transform_2, window_bounds = array<i64: 1, 128>}, {transform_indices = @transform_3, window_bounds = array<i64: 128, 128>}]} {
    %c128_i32 = arith.constant 128 : i32
    %0 = arith.muli %arg0, %c128_i32 : i32
    %1 = tpu.iota {dimensions = array<i32: 0>} : vector<128x128xi32>
    %2 = vector.broadcast %0 : i32 to vector<128x128xi32>
    %3 = arith.addi %1, %2 : vector<128x128xi32>
    %4 = tpu.iota {dimensions = array<i32: 1>} : vector<128x128xi32>
    %c128_i32_0 = arith.constant 128 : i32
    %5 = vector.broadcast %c128_i32_0 : i32 to vector<128x128xi32>
    %6 = arith.muli %3, %5 : vector<128x128xi32>
    %7 = arith.addi %6, %4 : vector<128x128xi32>
    %c0 = arith.constant 0 : index
    %8 = memref.load %arg1[%c0] : memref<1xi32, #tpu.memory_space<smem>>
    %c-1640531527_i32 = arith.constant -1640531527 : i32
    %9 = arith.muli %8, %c-1640531527_i32 : i32
    %10 = vector.broadcast %9 : i32 to vector<128x128xi32>
    %11 = arith.xori %7, %10 : vector<128x128xi32>
    %c-2048144789_i32 = arith.constant -2048144789 : i32
    %12 = vector.broadcast %c-2048144789_i32 : i32 to vector<128x128xi32>
    %13 = arith.muli %11, %12 : vector<128x128xi32>
    %c16_i32 = arith.constant 16 : i32
    %14 = vector.broadcast %c16_i32 : i32 to vector<128x128xi32>
    %15 = arith.shrsi %13, %14 : vector<128x128xi32>
    %c65535_i32 = arith.constant 65535 : i32
    %16 = vector.broadcast %c65535_i32 : i32 to vector<128x128xi32>
    %17 = arith.andi %15, %16 : vector<128x128xi32>
    %18 = arith.xori %13, %17 : vector<128x128xi32>
    %c-1028477387_i32 = arith.constant -1028477387 : i32
    %19 = vector.broadcast %c-1028477387_i32 : i32 to vector<128x128xi32>
    %20 = arith.muli %18, %19 : vector<128x128xi32>
    %c16_i32_1 = arith.constant 16 : i32
    %21 = vector.broadcast %c16_i32_1 : i32 to vector<128x128xi32>
    %22 = arith.shrsi %20, %21 : vector<128x128xi32>
    %c65535_i32_2 = arith.constant 65535 : i32
    %23 = vector.broadcast %c65535_i32_2 : i32 to vector<128x128xi32>
    %24 = arith.andi %22, %23 : vector<128x128xi32>
    %25 = arith.xori %20, %24 : vector<128x128xi32>
    %c0_i32 = arith.constant 0 : i32
    %26 = vector.broadcast %c0_i32 : i32 to vector<128x128xi32>
    %27 = arith.cmpi sge, %25, %26 : vector<128x128xi32>
    %c0_3 = arith.constant 0 : index
    %c0_4 = arith.constant 0 : index
    %28 = vector.load %arg2[%c0_3, %c0_4] : memref<128x128xf32, #tpu.memory_space<vmem>>, vector<128x128xf32>
    %cst = arith.constant 2.000000e+00 : f32
    %29 = vector.broadcast %cst : f32 to vector<128x128xf32>
    %30 = arith.mulf %28, %29 : vector<128x128xf32>
    %cst_5 = arith.constant 0.000000e+00 : f32
    %31 = vector.broadcast %cst_5 : f32 to vector<128x128xf32>
    %32 = arith.select %27, %30, %31 : vector<128x128xi1>, vector<128x128xf32>
    %33 = arith.truncf %32 : vector<128x128xf32> to vector<128x128xbf16>
    %c0_6 = arith.constant 0 : index
    %c0_7 = arith.constant 0 : index
    %34 = vector.load %arg3[%c0_6, %c0_7] : memref<128x128xbf16, #tpu.memory_space<vmem>>, vector<128x128xbf16>
    %cst_8 = arith.constant dense<0.000000e+00> : vector<128x128xf32>
    %35 = tpu.matmul %33, %34, %cst_8 {dimension_numbers = #tpu.dot_dimension_numbers<[1], [0], [0], [1], [0, 0, 1, 1], [], []>} : vector<128x128xbf16>, vector<128x128xbf16>, vector<128x128xf32> -> vector<128x128xf32>
    %c0_9 = arith.constant 0 : index
    %c0_10 = arith.constant 0 : index
    %36 = vector.load %arg4[%c0_9, %c0_10] : memref<1x128xf32, #tpu.memory_space<vmem>>, vector<1x128xf32>
    %37 = vector.broadcast %36 : vector<1x128xf32> to vector<128x128xf32>
    %38 = arith.addf %35, %37 : vector<128x128xf32>
    %cst_11 = arith.constant 0.000000e+00 : f32
    %39 = vector.broadcast %cst_11 : f32 to vector<128x128xf32>
    %40 = arith.maximumf %38, %39 : vector<128x128xf32>
    %c0_12 = arith.constant 0 : index
    %c0_13 = arith.constant 0 : index
    %41 = vector.load %arg5[%c0_12, %c0_13] : memref<128x128xf32, #tpu.memory_space<vmem>>, vector<128x128xf32>
    tpu.vector_store %arg5[%c0_12, %c0_13], %40 {strides = array<i32>} : memref<128x128xf32, #tpu.memory_space<vmem>>, vector<128x128xf32>,
    return
  }
  func.func @transform_0(%arg0: i32, %arg1: memref<1xi32, #tpu.memory_space<smem>>) -> (i32, i32) {
    %c0_i32 = arith.constant 0 : i32
    %c0_i32_0 = arith.constant 0 : i32
    return %arg0, %c0_i32 : i32, i32
  }
  func.func @transform_1(%arg0: i32, %arg1: memref<1xi32, #tpu.memory_space<smem>>) -> (i32, i32) {
    %c0_i32 = arith.constant 0 : i32
    %c0_i32_0 = arith.constant 0 : i32
    %c0_i32_1 = arith.constant 0 : i32
    return %c0_i32, %c0_i32_0 : i32, i32
  }
  func.func @transform_2(%arg0: i32, %arg1: memref<1xi32, #tpu.memory_space<smem>>) -> (i32, i32) {
    %c0_i32 = arith.constant 0 : i32
    %c0_i32_0 = arith.constant 0 : i32
    %c0_i32_1 = arith.constant 0 : i32
    return %c0_i32, %c0_i32_0 : i32, i32
  }
  func.func @transform_3(%arg0: i32, %arg1: memref<1xi32, #tpu.memory_space<smem>>) -> (i32, i32) {
    %c0_i32 = arith.constant 0 : i32
    %c0_i32_0 = arith.constant 0 : i32
    return %arg0, %c0_i32 : i32, i32
  }
}

</mosaic_0001>

<bundles_post_ra>
// kernel: tpu_custom_call.1
= control target key start
LH: loop header
LB: loop body
LE: loop exit
PB: predicated region body
PF: predicated region fallthrough
CT: control target
= control target key end

     0   :  { %s1576_s0 = inlined_call_operand.<no memory space> [shape: s32[1], index: 0, kind: input, shape index: {}]   ;;  %s1577_s1 = inlined_call_operand.hbm [shape: f32[256,128], index: 1, kind: input, shape index: {}]   ;;  %s1578_s2 = inlined_call_operand.hbm [shape: bf16[128,128], index: 2, kind: input, shape index: {}]   ;;  %s1579_s3 = inlined_call_operand.vmem [shape: f32[1,128], index: 3, kind: input, shape index: {}]   ;;  %s1580_s4 = inlined_call_operand.hbm [shape: f32[256,128], index: 4, kind: output, shape index: {}]  }
   0x1   :  { %9 = sst [smem:[#allocation3]] %s1576_s0 }
   0x2   :  { %10 = vsyncpa [#allocation5], 0 }
   0x3   :  { %12 = vsyncpa [#allocation5 + $0x1], 0 }
   0x4   :  { %13 = vsyncpa [#allocation8], 0 }
   0x5   :  { %14 = vsyncpa [#allocation6], 0 }
   0x6   :  { %16 = vsyncpa [#allocation6 + $0x1], 0  ;;  %s1180_s17 = smov 0   ;;  %s1182_s18 = smov 0  }
   0x7   :  { %s1184_s19 = smov 0   ;;  %s1186_s20 = smov 0  }
   0x8 LB: > { %s1201_s0 = sadd.s32 4294967295, %s1141_s20   ;;  %s794_s21 = sadd.s32 4294967294, %s1141_s20   ;;  %s1141_s20 = sphi %s1186_s20, %s1604_s20   ;;  %s1137_s19 = sphi %s1184_s19, %s1603_s19   ;;  %s1133_s18 = sphi %s1182_s18, %s1602_s18   ;;  %s1129_s17 = sphi %s1180_s17, %s1601_s17  }
   0x9   : > { %p42_p0 = scmp.ne.s32.totalorder %s1133_s18, %s1129_s17  ;;  %p1581_p1 = scmp.eq.s32.totalorder %s1201_s0, 0 }
   0xa   : > { %p114_p3 = scmp.eq.s32.totalorder %s794_s21, 1  ;;  %p795_p5 = scmp.ge.s32.totalorder %s1141_s20, 1 }
   0xb   : > { %p1210_p4 = por %p1581_p1, %p42_p0  ;;  %p121_p7 = scmp.lt.s32.totalorder %s1141_s20, 3 }
   0xc   : > { %p1215_p6 = por %p114_p3, %p42_p0  ;;  %s1143_s25 = smov [#allocation7]  }
   0xd   : > { %s1584_s22 = scalar_select %p1210_p4, 1, 0 }
   0xe   : > { %s1585_s23 = scalar_select %p1215_p6, 1, 0 }
   0xf   : > { %p1220_p8 = pnand %p795_p5, %p121_p7  ;;  %s133_s26 = sshll.u32 %s1143_s25, 4  ;;  %s1224_s26 = int_to_ptr.vmem [resolvable:$true] %s133_s26 }
  0x10   : > { %s1236_s28 = sadd.s32 1, %s1141_s20   ;;  %s29_s29 = sadd.s32 1, %s1137_s19 }
  0x11   : > { %s1586_s24 = scalar_select %p1220_p8, 1, 0 }
  0x12   : > { %p950_p9 = pneg %p1220_p8  ;;  %s26_s30 = ssub.s32 %s1141_s20, %s1236_s28 }
  0x13   : > { %s1013_s7 = scalar_lea.hbm %s1578_s2, 1024 }
  0x14   : > { %p1231_p11 = pnand %p950_p9, %p1581_p1  ;;  %p1014_p12 = scmp.ne.s32.totalorder %s1578_s2, %s1013_s7 }
  0x15   : > { %p1020_p5 = scmp.lt.u32.totalorder %s1013_s7, %s1578_s2 }
  0x16   : > { %p1015_p13 = pneg %p1231_p11 }
  0x18   : > { %p1016_p0 = pnand %p1015_p13, %p1014_p12 }
  0x1a   : > { %p1017_p3 = pneg %p1016_p0 }
  0x1c   : > { %p1022_p7 = pnand %p1020_p5, %p1017_p3 }
  0x1e   : > { %1025 = shalt.err (!%p1022_p7)
}
  0x1f   : > { %s1026_s12 = scalar_lea.vmem %s1224_s26, 1024  ;;  %p1034_p2 = scmp.lt.s32.totalorder %s1224_s26, %s1224_s26 }
  0x20   : > { %p1027_p9 = scmp.ne.s32.totalorder %s1224_s26, %s1026_s12  ;;  %p1035_p6 = scmp.lt.s32.totalorder %s1026_s12, %s1026_s12 }
  0x22   : > { %p1029_p10 = pnand %p1027_p9, %p1015_p13  ;;  %p1036_p4 = por %p1035_p6, %p1034_p2 }
  0x24   : > { %p1030_p1 = pneg %p1029_p10 }
  0x26   : > { %p1037_p8 = pnand %p1036_p4, %p1030_p1 }
  0x28   : > { %1040 = shalt.err (!%p1037_p8)
}
  0x29   : > { %s1144_s13 = smov 64   ;;  %s1145_s14 = smov 4  }
  0x2a   : > { %953 = dma.hbm_to_vmem [thread:$0]  (!%p1231_p11), %s1578_s2, 1024, %s1224_s26, [#allocation8], %s1144_s13, %s1144_s13, %s1145_s14  }
  0x2b   : > { %p27_p2 = scmp.eq.s32.totalorder %s26_s30, 0  ;;  %p36_p1 = scmp.ne.s32.totalorder %s1137_s19, %s1133_s18 }
  0x2c   : > { %p37_p4 = scmp.eq.s32.totalorder %s1141_s20, 0  ;;  %p963_p6 = scmp.lt.s32.totalorder %s1141_s20, 2 }
  0x2d   : > { %s1267_s21 = scalar_select %p27_p2, %s1137_s19, %s29_s29  }
  0x2e   : > { %p38_p8 = por %p37_p4, %p36_p1  ;;  %p1588_p10 = scmp.eq.s32.totalorder %s1201_s0, 1 }
  0x2f   : > { %s150_s5 = sand.u32 1, %s1137_s19   ;;  %s876_s6 = sshll.u32 %s1141_s20, 11 }
  0x30   : > { %p1271_p12 = por %p1588_p10, %p36_p1  ;;  %s798_s7 = sshll.u32 %s150_s5, 7 }
  0x31   : > { %s1280_s9 = scalar_lea.hbm %s1577_s1, %s876_s6  ;;  %s154_s26 = scalar_lea.vmem [#allocation4], %s798_s7 }
  0x32   : > { %s161_s29 = sshll.u32 %s154_s26, 4  ;;  %p1282_p11 = pnand %p963_p6, %p38_p8  ;;  %s1286_s29 = int_to_ptr.vmem [resolvable:$true] %s161_s29 }
  0x33   : > { %s1288_s10 = scalar_lea.sflag [#allocation5], %s150_s5  ;;  %s1041_s11 = scalar_lea.hbm %s1280_s9, 2048 }
  0x34   : > { %p1042_p13 = scmp.ne.s32.totalorder %s1280_s9, %s1041_s11  ;;  %p1043_p0 = pneg %p1282_p11 }
  0x35   : > { %s1046_s14 = scalar_lea.hbm %s1577_s1, 4096  ;;  %p1047_p7 = scmp.lt.u32.totalorder %s1280_s9, %s1577_s1 }
  0x36   : > { %p1044_p3 = pnand %p1043_p0, %p1042_p13  ;;  %p1048_p9 = scmp.lt.u32.totalorder %s1046_s14, %s1041_s11 }
  0x37   : > { %p1050_p1 = scmp.lt.u32.totalorder %s1041_s11, %s1280_s9 }
  0x38   : > { %p1045_p5 = pneg %p1044_p3  ;;  %p1049_p2 = por %p1048_p9, %p1047_p7 }
  0x3a   : > { %p1051_p4 = por %p1050_p1, %p1049_p2 }
  0x3c   : > { %p1052_p6 = pnand %p1051_p4, %p1045_p5 }
  0x3e   : > { %1055 = shalt.err (!%p1052_p6)
}
  0x3f   : > { %s1056_s5 = scalar_lea.vmem %s1286_s29, 2048  ;;  %s1146_s6 = smov [#allocation4]  }
  0x40   : > { %p1057_p8 = scmp.ne.s32.totalorder %s1286_s29, %s1056_s5  ;;  %s1061_s7 = sshll.u32 %s1146_s6, 4  ;;  %s1062_s7 = int_to_ptr.vmem [resolvable:$false] %s1061_s7 }
  0x41   : > { %s1063_s27 = scalar_lea.vmem %s1062_s7, 4096  ;;  %p1064_p3 = scmp.lt.s32.totalorder %s1286_s29, %s1062_s7 }
  0x42   : > { %p1059_p10 = pnand %p1057_p8, %p1043_p0  ;;  %p1065_p7 = scmp.lt.s32.totalorder %s1063_s27, %s1056_s5 }
  0x44   : > { %p1060_p13 = pneg %p1059_p10  ;;  %p1066_p9 = por %p1065_p7, %p1064_p3 }
  0x46   : > { %p1067_p2 = pnand %p1066_p9, %p1060_p13 }
  0x48   : > { %1070 = shalt.err (!%p1067_p2)
}
  0x49   : > { %s1147_s8 = smov 128   ;;  %s1148_s26 = smov 8  }
  0x4a   : > { %957 = dma.hbm_to_vmem [thread:$0]  (!%p1282_p11), %s1280_s9, 2048, %s1286_s29, %s1288_s10, %s1147_s8, %s1147_s8, %s1148_s26  }
  0x4b   : > { %p1591_p0 = scmp.ne.s32.totalorder %s1586_s24, 0 }
  0x4c   : > { %s1319_s11 = sand.u32 (!%p1591_p0), 1, %s1133_s18   ;;  %p1592_p5 = scmp.ne.s32.totalorder (!%p1591_p0), %s1584_s22, 0 }
  0x4d   : > { %173 = sbr.rel (%p1591_p0) target bundleno = 384 (0x180), region = 32  ;;  %s802_s12 = sshll.u32 (!%p1591_p0), %s1319_s11, 7 }
  0x4e   : > { %s176_s13 = scalar_lea.sflag (!%p1591_p0), [#allocation5], %s1319_s11  ;;  %s1325_s14 = scalar_lea.vmem (!%p1591_p0), [#allocation4], %s802_s12 }
  0x54   : > { %1116 = dma.done.wait (%p1592_p5), %s176_s13, 2048  }
  0x55   : > { %1118 = vsyncadd (%p1592_p5), %s176_s13, 4294965248  ;;  %p1593_p11 = scmp.eq.s32.totalorder %s1201_s0, 0 }
  0x57   : > { %1120 = dma.done.wait (%p1593_p11), [#allocation8], 1024   ;;  %p1594_p1 = pmov %p1593_p11 }
  0x58   : > { %s805_s24 = sshll.u32 %s1201_s0, 7  ;;  %v210_v0 = vlaneseq  ;;  %s1349_s22 = sld [smem:[#allocation3]]  ;;  %v1005_v14 = vld [vmem:[#allocation7] sm:$0xff]   ;;  %v1006_v16 = vld [vmem:[#allocation7 + $0x8] sm:$0xff]   ;;  %v1007_v25 = vld [vmem:[#allocation7 + $0x10] sm:$0xff]  }
  0x59   : > { %1122 = vsyncadd (%p1594_p1), [#allocation8], 4294966272  ;;  %v1338_v2 = vstv %s805_s24  ;;  %894 = vmatprep.subr.bf16.mxu0 %v1005_v14  ;;  %926 = vmatprep.subr.bf16.mxu1 %v1005_v14  ;;  %v1008_v30 = vld [vmem:[#allocation7 + $0x18] sm:$0xff]   ;;  %v441_v35 = vld [vmem:[%s1325_s14] sm:$0xff]  ;;  %s1507_s10 = scalar_lea.vmem [#allocation9], %s802_s12  ;;  %s877_s15 = sshll.u32 %s1201_s0, 11 }
  0x5a   : > { %v1336_v1 = vshrl.u32 %v210_v0, 7  ;;  %v1355_v17 = vand.u32 127, %v210_v0  ;;  %895 = vmatpush3.bf16.msra.mxu0 %v1005_v14  ;;  %934 = vmatpush3.bf16.msra.mxu1 %v1005_v14  ;;  %v442_v36 = vld [vmem:[%s1325_s14 + $0x8] sm:$0xff]  ;;  %v449_v37 = vld [vmem:[%s1325_s14 + $0x40] sm:$0xff]  ;;  %v1374_v42 = vmul.f32 2.0, %v441_v35  ;;  %v443_v46 = vld [vmem:[%s1325_s14 + $0x10] sm:$0xff]  ;;  %s1527_s0 = scalar_lea.hbm %s1580_s4, %s877_s15 }
  0x5b   : > { %896 = vmatprep.subr.bf16.mxu0 %v1006_v16  ;;  %927 = vmatprep.subr.bf16.mxu1 %v1006_v16  ;;  %v1376_v43 = vmul.f32 2.0, %v442_v36  ;;  %v450_v44 = vld [vmem:[%s1325_s14 + $0x48] sm:$0xff]  ;;  %v1379_v45 = vmul.f32 2.0, %v449_v37  ;;  %v444_v47 = vld [vmem:[%s1325_s14 + $0x18] sm:$0xff]  ;;  %v1388_v51 = vmul.f32 2.0, %v443_v46  ;;  %v451_v53 = vld [vmem:[%s1325_s14 + $0x50] sm:$0xff] }
  0x5c   : > { %v212_v3 = vadd.s32 8, %v1336_v1  ;;  %v219_v4 = vadd.s32 64, %v1336_v1  ;;  %v220_v5 = vadd.s32 72, %v1336_v1  ;;  %v228_v6 = vadd.s32 %v1338_v2, %v1336_v1  ;;  %v452_v54 = vld [vmem:[%s1325_s14 + $0x58] sm:$0xff]  ;;  %v1009_v59 = vld [vmem:[#allocation7 + $0x20] sm:$0xff]   ;;  %v1010_v14 = vld [vmem:[#allocation7 + $0x28] sm:$0xff]  }
  0x5d   : > { %v213_v7 = vadd.s32 16, %v1336_v1  ;;  %v214_v8 = vadd.s32 24, %v1336_v1  ;;  %v221_v9 = vadd.s32 80, %v1336_v1  ;;  %v222_v13 = vadd.s32 88, %v1336_v1  ;;  %s711_s16 = sshll.u32 %s1507_s10, 4  ;;  %s698_s7 = scalar_lea.sflag [#allocation6], %s1319_s11  ;;  %s1529_s16 = int_to_ptr.vmem [resolvable:$true] %s711_s16 }
  0x5e   : > { %v229_v10 = vadd.s32 %v1338_v2, %v212_v3  ;;  %v236_v11 = vadd.s32 %v1338_v2, %v219_v4  ;;  %v237_v12 = vadd.s32 %v1338_v2, %v220_v5  ;;  %v246_v19 = vmul.u32 128, %v228_v6  ;;  %897 = vmatpush3.bf16.msra.mxu0 %v1006_v16  ;;  %935 = vmatpush3.bf16.msra.mxu1 %v1006_v16  ;;  %s279_s9 = smul.u32 2654435769, %s1349_s22  ;;  %s1071_s27 = scalar_lea.vmem %s1529_s16, 2048 }
  0x5f   : > { %v230_v15 = vadd.s32 %v1338_v2, %v213_v7  ;;  %v231_v18 = vadd.s32 %v1338_v2, %v214_v8  ;;  %v238_v21 = vadd.s32 %v1338_v2, %v221_v9  ;;  %v239_v24 = vadd.s32 %v1338_v2, %v222_v13  ;;  %898 = vmatprep.subr.bf16.mxu0 %v1007_v25  ;;  %p1072_p4 = scmp.ne.s32.totalorder %s1529_s16, %s1071_s27  ;;  %s1149_s8 = smov [#allocation9]  }
  0x60   : > { %v247_v20 = vmul.u32 128, %v229_v10  ;;  %v254_v22 = vmul.u32 128, %v236_v11  ;;  %v262_v28 = vadd.s32 %v246_v19, %v1355_v17  ;;  %928 = vmatprep.subr.bf16.mxu1 %v1007_v25  ;;  %v1372_v41 = vadd.s32 32, %v1336_v1  ;;  %s1075_s26 = sshll.u32 %s1149_s8, 4  ;;  %s1076_s26 = int_to_ptr.vmem [resolvable:$false] %s1075_s26 }
  0x61   : > { %v255_v23 = vmul.u32 128, %v237_v12  ;;  %v248_v26 = vmul.u32 128, %v230_v15  ;;  %v1384_v49 = vstv %s279_s9  ;;  %v1386_v50 = vmul.f32 2.0, %v450_v44  ;;  %p1073_p6 = pnand %p1072_p4, %p1271_p12  ;;  %s1077_s12 = scalar_lea.vmem %s1076_s26, 4096 }
  0x62   : > { %v249_v27 = vmul.u32 128, %v231_v18  ;;  %v256_v29 = vmul.u32 128, %v238_v21  ;;  %v263_v31 = vadd.s32 %v247_v20, %v1355_v17  ;;  %v270_v32 = vadd.s32 %v254_v22, %v1355_v17  ;;  %899 = vmatpush3.bf16.msra.mxu0 %v1007_v25  ;;  %936 = vmatpush3.bf16.msra.mxu1 %v1007_v25  ;;  %p1078_p10 = scmp.lt.s32.totalorder %s1529_s16, %s1076_s26  ;;  %p1079_p13 = scmp.lt.s32.totalorder %s1077_s12, %s1071_s27 }
  0x63   : > { %v271_v33 = vadd.s32 %v255_v23, %v1355_v17  ;;  %v257_v34 = vmul.u32 128, %v239_v24  ;;  %v264_v38 = vadd.s32 %v248_v26, %v1355_v17  ;;  %v1390_v52 = vmul.f32 2.0, %v444_v47  ;;  %900 = vmatprep.subr.bf16.mxu0 %v1008_v30  ;;  %929 = vmatprep.subr.bf16.mxu1 %v1008_v30  ;;  %p1074_p8 = pneg %p1073_p6 }
  0x64   : > { %v265_v39 = vadd.s32 %v249_v27, %v1355_v17  ;;  %v272_v40 = vadd.s32 %v256_v29, %v1355_v17  ;;  %v281_v55 = vxor.u32 %v1384_v49, %v262_v28  ;;  %v282_v56 = vxor.u32 %v1384_v49, %v263_v31  ;;  %p1080_p3 = por %p1079_p13, %p1078_p10 }
  0x65   : > { %v273_v48 = vadd.s32 %v257_v34, %v1355_v17  ;;  %v848_v57 = vpack.c.bf16 %v1376_v43, %v1374_v42  ;;  %v1398_v58 = vmul.f32 2.0, %v451_v53  ;;  %v289_v60 = vxor.u32 %v1384_v49, %v270_v32  ;;  %v1011_v32 = vld [vmem:[#allocation7 + $0x30] sm:$0xff]  }
  0x66   : > { %v290_v61 = vxor.u32 %v1384_v49, %v271_v33  ;;  %v860_v62 = vpack.c.bf16 %v1386_v50, %v1379_v45  ;;  %v1404_v63 = vmul.f32 2.0, %v452_v54  ;;  %v297_v0 = vmul.u32 2246822507, %v281_v55  ;;  %901 = vmatpush3.bf16.msra.mxu0 %v1008_v30  ;;  %937 = vmatpush3.bf16.msra.mxu1 %v1008_v30  ;;  %p1081_p7 = pnand %p1080_p3, %p1074_p8 }
  0x67   : > { %v298_v3 = vmul.u32 2246822507, %v282_v56  ;;  %v283_v4 = vxor.u32 %v1384_v49, %v264_v38  ;;  %v284_v5 = vxor.u32 %v1384_v49, %v265_v39  ;;  %v305_v6 = vmul.u32 2246822507, %v289_v60  ;;  %902 = vmatprep.subr.bf16.mxu0 %v1009_v59  ;;  %930 = vmatprep.subr.bf16.mxu1 %v1009_v59 }
  0x68   : > { %v306_v7 = vmul.u32 2246822507, %v290_v61  ;;  %v851_v8 = vpack.c.bf16 %v1390_v52, %v1388_v51  ;;  %v291_v9 = vxor.u32 %v1384_v49, %v272_v40  ;;  %v806_v10 = vshrl.u32 %v297_v0, 16 }
  0x69   : > { %v807_v11 = vshrl.u32 %v298_v3, 16  ;;  %v299_v12 = vmul.u32 2246822507, %v283_v4  ;;  %v300_v13 = vmul.u32 2246822507, %v284_v5  ;;  %v814_v15 = vshrl.u32 %v305_v6, 16 }
  0x6a   : > { %v815_v16 = vshrl.u32 %v306_v7, 16  ;;  %v292_v18 = vxor.u32 %v1384_v49, %v273_v48  ;;  %v307_v19 = vmul.u32 2246822507, %v291_v9  ;;  %v345_v20 = vxor.u32 %v806_v10, %v297_v0  ;;  %903 = vmatpush3.bf16.msra.mxu0 %v1009_v59  ;;  %938 = vmatpush3.bf16.msra.mxu1 %v1009_v59  ;;  %v1012_v59 = vld [vmem:[#allocation7 + $0x38] sm:$0xff]  }
  0x6b   : > { %v346_v21 = vxor.u32 %v807_v11, %v298_v3  ;;  %v808_v22 = vshrl.u32 %v299_v12, 16  ;;  %v809_v23 = vshrl.u32 %v300_v13, 16  ;;  %v353_v24 = vxor.u32 %v814_v15, %v305_v6  ;;  %904 = vmatprep.subr.bf16.mxu0 %v1010_v14  ;;  %931 = vmatprep.subr.bf16.mxu1 %v1010_v14  ;;  %v445_v6 = vld [vmem:[%s1325_s14 + $0x20] sm:$0xff]  ;;  %v446_v11 = vld [vmem:[%s1325_s14 + $0x28] sm:$0xff] }
  0x6c   : > { %v354_v25 = vxor.u32 %v815_v16, %v306_v7  ;;  %v308_v26 = vmul.u32 2246822507, %v292_v18  ;;  %v816_v27 = vshrl.u32 %v307_v19, 16  ;;  %v361_v28 = vmul.u32 3266489909, %v345_v20  ;;  %v454_v15 = vld [vmem:[%s1325_s14 + $0x68] sm:$0xff] }
  0x6d   : > { %v362_v29 = vmul.u32 3266489909, %v346_v21  ;;  %v347_v30 = vxor.u32 %v808_v22, %v299_v12  ;;  %v348_v31 = vxor.u32 %v809_v23, %v300_v13  ;;  %v369_v33 = vmul.u32 3266489909, %v353_v24  ;;  %v447_v22 = vld [vmem:[%s1325_s14 + $0x30] sm:$0xff] }
  0x6e   : > { %v370_v34 = vmul.u32 3266489909, %v354_v25  ;;  %v817_v35 = vshrl.u32 %v308_v26, 16  ;;  %v355_v36 = vxor.u32 %v816_v27, %v307_v19  ;;  %v822_v37 = vshrl.u32 %v361_v28, 16  ;;  %905 = vmatpush3.bf16.msra.mxu0 %v1010_v14  ;;  %939 = vmatpush3.bf16.msra.mxu1 %v1010_v14  ;;  %v453_v14 = vld [vmem:[%s1325_s14 + $0x60] sm:$0xff] }
  0x6f   : > { %v823_v38 = vshrl.u32 %v362_v29, 16  ;;  %v363_v39 = vmul.u32 3266489909, %v347_v30  ;;  %v364_v40 = vmul.u32 3266489909, %v348_v31  ;;  %v830_v44 = vshrl.u32 %v369_v33, 16  ;;  %906 = vmatprep.subr.bf16.mxu0 %v1011_v32  ;;  %932 = vmatprep.subr.bf16.mxu1 %v1011_v32 }
  0x70   : > { %v831_v46 = vshrl.u32 %v370_v34, 16  ;;  %v356_v47 = vxor.u32 %v817_v35, %v308_v26  ;;  %v371_v48 = vmul.u32 3266489909, %v355_v36  ;;  %v409_v53 = vxor.u32 %v822_v37, %v361_v28  ;;  %v448_v31 = vld [vmem:[%s1325_s14 + $0x38] sm:$0xff] }
  0x71   : > { %v410_v54 = vxor.u32 %v823_v38, %v362_v29  ;;  %v824_v55 = vshrl.u32 %v363_v39, 16  ;;  %v825_v56 = vshrl.u32 %v364_v40, 16  ;;  %v417_v60 = vxor.u32 %v830_v44, %v369_v33 }
  0x72   : > { %v418_v61 = vxor.u32 %v831_v46, %v370_v34  ;;  %v372_v0 = vmul.u32 3266489909, %v356_v47  ;;  %v832_v3 = vshrl.u32 %v371_v48, 16  ;;  %vm425_vm0 = vcmp.ge.s32.totalorder %v409_v53, 0  ;;  %907 = vmatpush3.bf16.msra.mxu0 %v1011_v32  ;;  %940 = vmatpush3.bf16.msra.mxu1 %v1011_v32 }
  0x73   : > { %vm426_vm1 = vcmp.ge.s32.totalorder %v410_v54, 0  ;;  %v411_v4 = vxor.u32 %v824_v55, %v363_v39  ;;  %v412_v5 = vxor.u32 %v825_v56, %v364_v40  ;;  %vm433_vm3 = vcmp.ge.s32.totalorder %v417_v60, 0  ;;  %908 = vmatprep.subr.bf16.mxu0 %v1012_v59  ;;  %933 = vmatprep.subr.bf16.mxu1 %v1012_v59 }
  0x74   : > { %vm1413_vm2 = vmpackc.low %vm426_vm1, %vm425_vm0  ;;  %vm434_vm4 = vcmp.ge.s32.totalorder %v418_v61, 0  ;;  %v833_v9 = vshrl.u32 %v372_v0, 16  ;;  %v419_v10 = vxor.u32 %v832_v3, %v371_v48  ;;  %v863_v12 = vpack.c.bf16 %v1404_v63, %v1398_v58 }
  0x75   : > { %vm859_vm5 = vmpackc.low %vm434_vm4, %vm433_vm3  ;;  %vm427_vm6 = vcmp.ge.s32.totalorder %v411_v4, 0  ;;  %vm428_vm7 = vcmp.ge.s32.totalorder %v412_v5, 0  ;;  %v216_v13 = vadd.s32 40, %v1336_v1  ;;  %v232_v18 = vadd.s32 %v1338_v2, %v1372_v41  ;;  %910 = vmatprep.mubr.msk.bf16.mxu0 %vm1413_vm2, %v848_v57 }
  0x76   : > { %v420_v16 = vxor.u32 %v833_v9, %v372_v0  ;;  %vm435_vm8 = vcmp.ge.s32.totalorder %v419_v10, 0  ;;  %v1425_v19 = vmul.f32 2.0, %v445_v6  ;;  %918 = vmatprep.mubr.msk.bf16.mxu1 %vm859_vm5, %v860_v62  ;;  %v1436_v63 = vmul.f32 2.0, %v446_v11  ;;  %vm1442_vm9 = vmpackc.low %vm428_vm7, %vm427_vm6  ;;  %909 = vmatpush3.bf16.msra.mxu0 %v1012_v59 }
  0x77   : > { %v233_v58 = vadd.s32 %v1338_v2, %v216_v13  ;;  %v223_v20 = vadd.s32 96, %v1336_v1  ;;  %v224_v41 = vadd.s32 104, %v1336_v1  ;;  %v250_v43 = vmul.u32 128, %v232_v18  ;;  %941 = vmatpush3.bf16.msra.mxu1 %v1012_v59 }
  0x78   : > { %vm436_vm10 = vcmp.ge.s32.totalorder %v420_v16, 0  ;;  %v1446_v57 = vmul.f32 2.0, %v453_v14  ;;  %v1448_v45 = vmul.f32 2.0, %v454_v15  ;;  %v854_v24 = vpack.c.bf16 %v1436_v63, %v1425_v19 }
  0x79   : > { %vm862_vm11 = vmpackc.low %vm436_vm10, %vm435_vm8  ;;  %v251_v50 = vmul.u32 128, %v233_v58  ;;  %v240_v62 = vadd.s32 %v1338_v2, %v223_v20  ;;  %v241_v21 = vadd.s32 %v1338_v2, %v224_v41  ;;  %v266_v23 = vadd.s32 %v250_v43, %v1355_v17  ;;  %911 = vmatmul.mubr.msk.bf16.vlgmr.msra.gmra.mrb[0].mxu0 %vm1442_vm9, %v851_v8 }
  0x7a   : > { %v217_v25 = vadd.s32 48, %v1336_v1  ;;  %v218_v26 = vadd.s32 56, %v1336_v1  ;;  %v866_v30 = vpack.c.bf16 %v1448_v45, %v1446_v57  ;;  %919 = vmatmul.mubr.msk.bf16.vlgmr.msra.gmra.mrb[0].mxu1 %vm862_vm11, %v863_v12  ;;  %v1471_v35 = vmul.f32 2.0, %v447_v22  ;;  %v838_v57 = vld [vmem:[%s1579_s3] ss:$0 sm:$0xff] }
  0x7b   : > { %v267_v27 = vadd.s32 %v251_v50, %v1355_v17  ;;  %v258_v28 = vmul.u32 128, %v240_v62  ;;  %v259_v29 = vmul.u32 128, %v241_v21  ;;  %v285_v32 = vxor.u32 %v1384_v49, %v266_v23 }
  0x7c   : > { %v234_v33 = vadd.s32 %v1338_v2, %v217_v25  ;;  %v235_v34 = vadd.s32 %v1338_v2, %v218_v26  ;;  %v225_v51 = vadd.s32 112, %v1336_v1  ;;  %v1477_v8 = vmul.f32 2.0, %v448_v31 }
  0x7d   : > { %v286_v36 = vxor.u32 %v1384_v49, %v267_v27  ;;  %v274_v37 = vadd.s32 %v258_v28, %v1355_v17  ;;  %v275_v38 = vadd.s32 %v259_v29, %v1355_v17  ;;  %v301_v52 = vmul.u32 2246822507, %v285_v32 }
  0x7e   : > { %v252_v39 = vmul.u32 128, %v234_v33  ;;  %v226_v40 = vadd.s32 120, %v1336_v1  ;;  %v253_v48 = vmul.u32 128, %v235_v34  ;;  %v242_v55 = vadd.s32 %v1338_v2, %v225_v51  ;;  %v455_v34 = vld [vmem:[%s1325_s14 + $0x70] sm:$0xff] }
  0x7f   : > { %v302_v44 = vmul.u32 2246822507, %v286_v36  ;;  %v293_v46 = vxor.u32 %v1384_v49, %v274_v37  ;;  %v294_v47 = vxor.u32 %v1384_v49, %v275_v38  ;;  %v810_v53 = vshrl.u32 %v301_v52, 16  ;;  %v456_v38 = vld [vmem:[%s1325_s14 + $0x78] sm:$0xff] }
  0x80   : > { %v268_v54 = vadd.s32 %v252_v39, %v1355_v17  ;;  %v243_v56 = vadd.s32 %v1338_v2, %v226_v40  ;;  %v269_v0 = vadd.s32 %v253_v48, %v1355_v17  ;;  %v260_v4 = vmul.u32 128, %v242_v55 }
  0x81   : > { %v811_v59 = vshrl.u32 %v302_v44, 16  ;;  %v309_v60 = vmul.u32 2246822507, %v293_v46  ;;  %v310_v61 = vmul.u32 2246822507, %v294_v47  ;;  %v349_v3 = vxor.u32 %v810_v53, %v301_v52 }
  0x82   : > { %v287_v1 = vxor.u32 %v1384_v49, %v268_v54  ;;  %v261_v5 = vmul.u32 128, %v243_v56  ;;  %v288_v10 = vxor.u32 %v1384_v49, %v269_v0  ;;  %v276_v13 = vadd.s32 %v260_v4, %v1355_v17 }
  0x83   : > { %v350_v6 = vxor.u32 %v811_v59, %v302_v44  ;;  %v818_v7 = vshrl.u32 %v309_v60, 16  ;;  %v819_v9 = vshrl.u32 %v310_v61, 16  ;;  %v365_v11 = vmul.u32 3266489909, %v349_v3 }
  0x84   : > { %v303_v12 = vmul.u32 2246822507, %v287_v1  ;;  %v277_v2 = vadd.s32 %v261_v5, %v1355_v17  ;;  %v304_v18 = vmul.u32 2246822507, %v288_v10  ;;  %v295_v41 = vxor.u32 %v1384_v49, %v276_v13 }
  0x85   : > { %v366_v14 = vmul.u32 3266489909, %v350_v6  ;;  %v357_v15 = vxor.u32 %v818_v7, %v309_v60  ;;  %v358_v16 = vxor.u32 %v819_v9, %v310_v61  ;;  %v826_v58 = vshrl.u32 %v365_v11, 16 }
  0x86   : > { %v812_v20 = vshrl.u32 %v303_v12, 16  ;;  %v296_v42 = vxor.u32 %v1384_v49, %v277_v2  ;;  %v813_v21 = vshrl.u32 %v304_v18, 16  ;;  %v311_v25 = vmul.u32 2246822507, %v295_v41 }
  0x87   : > { %v827_v43 = vshrl.u32 %v366_v14, 16  ;;  %v373_v50 = vmul.u32 3266489909, %v357_v15  ;;  %v374_v62 = vmul.u32 3266489909, %v358_v16  ;;  %v413_v22 = vxor.u32 %v826_v58, %v365_v11 }
  0x88   : > { %v351_v23 = vxor.u32 %v812_v20, %v303_v12  ;;  %v312_v17 = vmul.u32 2246822507, %v296_v42  ;;  %v352_v29 = vxor.u32 %v813_v21, %v304_v18  ;;  %v820_v32 = vshrl.u32 %v311_v25, 16 }
  0x89   : > { %v414_v26 = vxor.u32 %v827_v43, %v366_v14  ;;  %v834_v27 = vshrl.u32 %v373_v50, 16  ;;  %v835_v28 = vshrl.u32 %v374_v62, 16  ;;  %vm429_vm12 = vcmp.ge.s32.totalorder %v413_v22, 0 }
  0x8a   : > { %v367_v31 = vmul.u32 3266489909, %v351_v23  ;;  %v821_v33 = vshrl.u32 %v312_v17, 16  ;;  %v368_v37 = vmul.u32 3266489909, %v352_v29  ;;  %v359_v52 = vxor.u32 %v820_v32, %v311_v25 }
  0x8b   : > { %vm430_vm13 = vcmp.ge.s32.totalorder %v414_v26, 0  ;;  %v421_v49 = vxor.u32 %v834_v27, %v373_v50  ;;  %v422_v36 = vxor.u32 %v835_v28, %v374_v62  ;;  %v471_v44 = vmul.f32 2.0, %v455_v34 }
  0x8c   : > { %vm853_vm14 = vmpackc.low %vm430_vm13, %vm429_vm12  ;;  %v828_v51 = vshrl.u32 %v367_v31, 16  ;;  %v360_v39 = vxor.u32 %v821_v33, %v312_v17  ;;  %v829_v40 = vshrl.u32 %v368_v37, 16  ;;  %v375_v47 = vmul.u32 3266489909, %v359_v52 }
  0x8d   : > { %914 = vmatprep.mubr.msk.bf16.mxu0 %vm853_vm14, %v854_v24  ;;  %vm437_vm15 = vcmp.ge.s32.totalorder %v421_v49, 0  ;;  %vm438_vm0 = vcmp.ge.s32.totalorder %v422_v36, 0  ;;  %v472_v53 = vmul.f32 2.0, %v456_v38  ;;  %v857_v55 = vpack.c.bf16 %v1477_v8, %v1471_v35 }
  0x8e   : > { %vm865_vm1 = vmpackc.low %vm438_vm0, %vm437_vm15  ;;  %v415_v46 = vxor.u32 %v828_v51, %v367_v31  ;;  %v376_v48 = vmul.u32 3266489909, %v360_v39  ;;  %v416_v54 = vxor.u32 %v829_v40, %v368_v37  ;;  %v836_v19 = vshrl.u32 %v375_v47, 16 }
  0x8f   : > { %922 = vmatprep.mubr.msk.bf16.mxu1 %vm865_vm1, %v866_v30  ;;  %v869_v59 = vpack.c.bf16 %v472_v53, %v471_v44 }
  0x90   : > { %vm431_vm2 = vcmp.ge.s32.totalorder %v415_v46, 0  ;;  %v837_v63 = vshrl.u32 %v376_v48, 16  ;;  %vm432_vm3 = vcmp.ge.s32.totalorder %v416_v54, 0  ;;  %v423_v24 = vxor.u32 %v836_v19, %v375_v47 }
  0x91   : > { %vm856_vm4 = vmpackc.low %vm432_vm3, %vm431_vm2 }
  0x92   : > { %v424_v56 = vxor.u32 %v837_v63, %v376_v48  ;;  %915 = vmatmul.mubr.msk.bf16.gmra.mrb[4].mxu0 %vm856_vm4, %v857_v55  ;;  %vm439_vm5 = vcmp.ge.s32.totalorder %v423_v24, 0 }
  0x94   : > { %vm440_vm6 = vcmp.ge.s32.totalorder %v424_v56, 0 }
  0x95   : > { %vm868_vm7 = vmpackc.low %vm440_vm6, %vm439_vm5 }
  0x96   : > { %923 = vmatmul.mubr.msk.bf16.gmra.mrb[4].mxu1 %vm868_vm7, %v869_v59 }
 0x14c   : > { %v912_v45 = vpop.f32.mrb[0].mxu0 }
 0x14d   : > { %v920_v30 = vpop.f32.mrb[0].mxu1  ;;  %v611_v35 = vadd.f32 %v912_v45, %v838_v57  ;;  %v602_v60 = vpop.f32.mrb[1].mxu0 }
 0x14e   : > { %v643_v8 = vadd.f32 %v920_v30, %v838_v57  ;;  %v634_v61 = vpop.f32.mrb[1].mxu1  ;;  %v603_v0 = vadd.f32 %v838_v57, %v602_v60  ;;  %v913_v1 = vpop.f32.mrb[2].mxu0 }
 0x14f   : > { %v635_v3 = vadd.f32 %v838_v57, %v634_v61  ;;  %v921_v4 = vpop.f32.mrb[2].mxu1  ;;  %v667_v5 = vmax.f32 %v611_v35, 0.0  ;;  %v614_v7 = vadd.f32 %v913_v1, %v838_v57  ;;  %v605_v10 = vpop.f32.mrb[3].mxu0 }
 0x150   : > { %v675_v6 = vmax.f32 %v643_v8, 0.0  ;;  %v646_v9 = vadd.f32 %v921_v4, %v838_v57  ;;  %v637_v11 = vpop.f32.mrb[3].mxu1  ;;  %v665_v12 = vmax.f32 %v603_v0, 0.0  ;;  %v606_v2 = vadd.f32 %v838_v57, %v605_v10 }
 0x151   : > { %v673_v13 = vmax.f32 %v635_v3, 0.0  ;;  %v638_v14 = vadd.f32 %v838_v57, %v637_v11  ;;  %683 = vst [vmem:[%s1507_s10 + $0x10] sm:$0xff] %v667_v5  ;;  %v668_v15 = vmax.f32 %v614_v7, 0.0 }
 0x152   : > { %691 = vst [vmem:[%s1507_s10 + $0x50] sm:$0xff] %v675_v6  ;;  %v676_v16 = vmax.f32 %v646_v9, 0.0  ;;  %681 = vst [vmem:[%s1507_s10] sm:$0xff] %v665_v12  ;;  %v666_v18 = vmax.f32 %v606_v2, 0.0 }
 0x153   : > { %689 = vst [vmem:[%s1507_s10 + $0x40] sm:$0xff] %v673_v13  ;;  %v674_v58 = vmax.f32 %v638_v14, 0.0  ;;  %684 = vst [vmem:[%s1507_s10 + $0x18] sm:$0xff] %v668_v15 }
 0x154   : > { %692 = vst [vmem:[%s1507_s10 + $0x58] sm:$0xff] %v676_v16  ;;  %682 = vst [vmem:[%s1507_s10 + $0x8] sm:$0xff] %v666_v18 }
 0x155   : > { %690 = vst [vmem:[%s1507_s10 + $0x48] sm:$0xff] %v674_v58 }
 0x165   : > { %v916_v20 = vpop.f32.mrb[4].mxu0 }
 0x166   : > { %v627_v41 = vadd.f32 %v916_v20, %v838_v57  ;;  %v618_v42 = vpop.f32.mrb[5].mxu0 }
 0x167   : > { %v619_v43 = vadd.f32 %v838_v57, %v618_v42  ;;  %v917_v50 = vpop.f32.mrb[6].mxu0 }
 0x168   : > { %v671_v62 = vmax.f32 %v627_v41, 0.0  ;;  %v630_v22 = vadd.f32 %v917_v50, %v838_v57  ;;  %v621_v23 = vpop.f32.mrb[7].mxu0 }
 0x169   : > { %v924_v21 = vpop.f32.mrb[4].mxu1  ;;  %v669_v17 = vmax.f32 %v619_v43, 0.0  ;;  %v622_v27 = vadd.f32 %v838_v57, %v621_v23 }
 0x16a   : > { %v659_v25 = vadd.f32 %v924_v21, %v838_v57  ;;  %v650_v26 = vpop.f32.mrb[5].mxu1  ;;  %687 = vst [vmem:[%s1507_s10 + $0x30] sm:$0xff] %v671_v62  ;;  %v672_v29 = vmax.f32 %v630_v22, 0.0 }
 0x16b   : > { %v651_v28 = vadd.f32 %v838_v57, %v650_v26  ;;  %v925_v31 = vpop.f32.mrb[6].mxu1  ;;  %685 = vst [vmem:[%s1507_s10 + $0x20] sm:$0xff] %v669_v17  ;;  %v670_v34 = vmax.f32 %v622_v27, 0.0 }
 0x16c   : > { %v679_v32 = vmax.f32 %v659_v25, 0.0  ;;  %v662_v33 = vadd.f32 %v925_v31, %v838_v57  ;;  %v653_v49 = vpop.f32.mrb[7].mxu1  ;;  %688 = vst [vmem:[%s1507_s10 + $0x38] sm:$0xff] %v672_v29 }
 0x16d   : > { %v677_v36 = vmax.f32 %v651_v28, 0.0  ;;  %v654_v37 = vadd.f32 %v838_v57, %v653_v49  ;;  %686 = vst [vmem:[%s1507_s10 + $0x28] sm:$0xff] %v670_v34 }
 0x16e   : > { %695 = vst [vmem:[%s1507_s10 + $0x70] sm:$0xff] %v679_v32  ;;  %v680_v38 = vmax.f32 %v662_v33, 0.0 }
 0x16f   : > { %693 = vst [vmem:[%s1507_s10 + $0x60] sm:$0xff] %v677_v36  ;;  %v678_v51 = vmax.f32 %v654_v37, 0.0 }
 0x170   : > { %696 = vst [vmem:[%s1507_s10 + $0x78] sm:$0xff] %v680_v38 }
 0x171   : > { %694 = vst [vmem:[%s1507_s10 + $0x68] sm:$0xff] %v678_v51 }
 0x172   : > { %1084 = shalt.err (!%p1081_p7)
}
 0x173   : > { %s1085_s13 = scalar_lea.hbm %s1527_s0, 2048  ;;  %s1089_s22 = scalar_lea.hbm %s1580_s4, 4096 }
 0x174   : > { %p1086_p9 = scmp.ne.s32.totalorder %s1527_s0, %s1085_s13  ;;  %p1090_p5 = scmp.lt.u32.totalorder %s1527_s0, %s1580_s4 }
 0x175   : > { %p1091_p11 = scmp.lt.u32.totalorder %s1089_s22, %s1085_s13  ;;  %p1093_p4 = scmp.lt.u32.totalorder %s1085_s13, %s1527_s0 }
 0x176   : > { %p1087_p2 = pnand %p1086_p9, %p1271_p12 }
 0x177   : > { %p1092_p1 = por %p1091_p11, %p1090_p5 }
 0x178   : > { %p1088_p0 = pneg %p1087_p2 }
 0x179   : > { %p1094_p6 = por %p1093_p4, %p1092_p1 }
 0x17b   : > { %p1095_p8 = pnand %p1094_p6, %p1088_p0 }
 0x17d   : > { %1098 = shalt.err (!%p1095_p8)
}
 0x17e   : > { %s1150_s30 = smov 128   ;;  %s1151_s10 = smov 8  }
 0x17f   : > { %948 = dma.vmem_to_hbm [thread:$0]  (%p1271_p12), %s1529_s16, 2048, %s1527_s0, %s698_s7, %s1150_s30, %s1150_s30, %s1151_s10  }
 0x180 PF: > { %s726_s15 = sand.u32 1, %s1129_s17   ;;  %p1599_p10 = scmp.ne.s32.totalorder %s1585_s23, 0 }
 0x181   : > { %p1600_p13 = scmp.ge.s32.totalorder %s1141_s20, 2  ;;  %s727_s5 = scalar_lea.sflag [#allocation6], %s726_s15 }
 0x183   : > { %p959_p3 = pnand %p1600_p13, %p1599_p10 }
 0x185   : > { %1124 = dma.done.wait (!%p959_p3), %s727_s5, 2048  }
 0x186   : > { %1126 = vsyncadd (!%p959_p3), %s727_s5, 4294965248  ;;  %p19_p7 = scmp.ge.s32.totalorder %s1236_s28, 4   ;;  %s1601_s17 = smov %s1133_s18 }
 0x187   : > { %s1602_s18 = smov %s1137_s19  ;;  %s1603_s19 = smov %s1267_s21 }
 0x188   : > { %s1604_s20 = smov %s1236_s28  ;;  %21 = sbr.rel (!%p19_p7) target bundleno = 8 (0x8), region = 81 }
 0x18f   :  { %732 = vsyncpa [#allocation5], 1 }
 0x190   :  { %734 = vsyncpa [#allocation5 + $0x1], 1 }
 0x191   :  { %735 = vsyncpa [#allocation8], 1 }
 0x192   :  { %736 = vsyncpa [#allocation6], 1 }
 0x193   :  { %738 = vsyncpa [#allocation6 + $0x1], 1 }

</bundles_post_ra>
